<compile_context>
chip_gen: v7x
topology: tpu7x:2x2x1
jax: 0.10.0
libtpu: 0.0.40
codegen_flags: <defaults>
</compile_context>

<pallas_src>
import jax
import jax.numpy as jnp
from jax.experimental import pallas as pl
from jax.experimental.pallas import tpu as pltpu

_LANE = 128
_SUBLANE = 8
_BLOCK_M = 8192               # 8192 * 128 * 4 B = 4 MiB per f32 array per block
_VMEM_LIMIT_BYTES = 48 << 20  # 3 arrays x 2 buffers x 4 MiB = 24 MiB I/O + headroom;
                              # safe on v5e/v6e (128 MiB phys) and v7x (64 MiB phys)


def _round_up(x, m):
    return (x + m - 1) // m * m


def _make_bce_kernel(pos_weight):
    pw = float(pos_weight)

    def kernel(x_ref, y_ref, o_ref):
        x = x_ref[...].astype(jnp.float32)
        y = y_ref[...].astype(jnp.float32)
        # Numerically stable softplus(-x) = log1p(exp(-|x|)) + max(-x, 0)
        softplus_neg_x = jnp.log1p(jnp.exp(-jnp.abs(x))) + jnp.maximum(-x, 0.0)
        if pw == 1.0:
            loss = (1.0 - y) * x + softplus_neg_x
        else:
            log_weight = 1.0 + (pw - 1.0) * y
            loss = (1.0 - y) * x + log_weight * softplus_neg_x
        o_ref[...] = loss.astype(o_ref.dtype)

    return kernel


def _bce_math_jnp(x, y, pos_weight, out_dtype):
    # Plain-jnp path for the <128-element ragged tail (and tiny inputs).
    x = x.astype(jnp.float32)
    y = y.astype(jnp.float32)
    sp = jnp.log1p(jnp.exp(-jnp.abs(x))) + jnp.maximum(-x, 0.0)
    lw = 1.0 + (float(pos_weight) - 1.0) * y
    return ((1.0 - y) * x + lw * sp).astype(out_dtype)


def _bce_kernel_2d(x2, y2, pos_weight, out_dtype):
    """Run the element-wise kernel on a lane-dense (M, 128) slab."""
    M = x2.shape[0]

    # Tile selection: largest block that fits the VMEM budget, but guarantee
    # >= 2 grid steps (sublane-aligned) so both v7x TensorCores get work.
    if M <= _SUBLANE:
        block_m = M                                   # full-extent block (tiny input)
    else:
        block_m = min(_BLOCK_M, _round_up(pl.cdiv(M, 2), _SUBLANE))
    grid = (pl.cdiv(M, block_m),)

    n = M * _LANE
    in_bytes = jnp.dtype(x2.dtype).itemsize
    out_bytes = jnp.dtype(out_dtype).itemsize
    cost = pl.CostEstimate(
        flops=8 * n,
        transcendentals=2 * n,
        bytes_accessed=n * (2 * in_bytes + out_bytes),
    )

    return pl.pallas_call(
        _make_bce_kernel(pos_weight),
        out_shape=jax.ShapeDtypeStruct((M, _LANE), out_dtype),
        grid=grid,
        in_specs=[
            pl.BlockSpec((block_m, _LANE), lambda i: (i, 0)),
            pl.BlockSpec((block_m, _LANE), lambda i: (i, 0)),
        ],
        out_specs=pl.BlockSpec((block_m, _LANE), lambda i: (i, 0)),
        compiler_params=pltpu.CompilerParams(
            dimension_semantics=("parallel",),
            vmem_limit_bytes=_VMEM_LIMIT_BYTES,
        ),
        cost_estimate=cost,
    )(x2, y2)


def bce_with_logits_loss(prediction, targets, pos_weight=1.0):
    """Element-wise ('none' reduction) BCE-with-logits loss via a Pallas TPU kernel.

    # TODO(synk): the PyTorch module passes reduction=None straight through to
    # nn.BCEWithLogitsLoss; we return the unreduced per-element loss here.
    # TODO(synk): pos_weight is handled as a compile-time scalar (matches the
    # module's default float); per-class pos_weight vectors would need a
    # lane-aligned extra input instead of the flat (M, 128) layout.
    """
    assert prediction.shape == targets.shape, "prediction/targets must have the same shape"
    orig_shape = prediction.shape
    out_dtype = prediction.dtype
    n = prediction.size

    x = prediction.reshape(-1)   # contiguous reshape: free
    y = targets.reshape(-1)

    n_head = (n // _LANE) * _LANE
    rem = n - n_head

    if n_head == 0:
        # Tiny (<128 element) input: a kernel launch + padding pass costs more
        # than the math itself.
        return _bce_math_jnp(x, y, pos_weight, out_dtype).reshape(orig_shape)

    x_head = x[:n_head].reshape(n_head // _LANE, _LANE)
    y_head = y[:n_head].reshape(n_head // _LANE, _LANE)
    out_head = _bce_kernel_2d(x_head, y_head, pos_weight, out_dtype).reshape(-1)

    if rem == 0:
        return out_head.reshape(orig_shape)

    # Ragged <128-element tail handled in plain jnp: no pad / slice HBM passes.
    out_tail = _bce_math_jnp(x[n_head:], y[n_head:], pos_weight, out_dtype)
    return jnp.concatenate([out_head, out_tail]).reshape(orig_shape)


def _reference_bce(x, y, pos_weight=1.0):
    x = x.astype(jnp.float32)
    y = y.astype(jnp.float32)
    log_weight = 1.0 + (pos_weight - 1.0) * y
    return (1.0 - y) * x + log_weight * (jnp.log1p(jnp.exp(-jnp.abs(x))) + jnp.maximum(-x, 0.0))


if __name__ == "__main__":
    key = jax.random.PRNGKey(0)
    k1, k2 = jax.random.split(key)

    # Small NCHW shape: batch=2, channels=4, spatial=16x16.
    shape = (2, 4, 16, 16)
    prediction = jax.random.normal(k1, shape, dtype=jnp.float32)  # logits
    targets = (jax.random.uniform(k2, shape) > 0.5).astype(jnp.float32)

    ok = True

    # Default pos_weight = 1.0 (specialized fast path).
    loss = jax.block_until_ready(bce_with_logits_loss(prediction, targets, pos_weight=1.0))
    ref = _reference_bce(prediction, targets, pos_weight=1.0)
    ok &= loss.shape == shape
    ok &= bool(jnp.allclose(loss, ref, atol=1e-5, rtol=1e-5))

    # Non-trivial pos_weight path.
    loss2 = jax.block_until_ready(bce_with_logits_loss(prediction, targets, pos_weight=2.0))
    ref2 = _reference_bce(prediction, targets, pos_weight=2.0)
    ok &= bool(jnp.allclose(loss2, ref2, atol=1e-5, rtol=1e-5))

    # Ragged-size path (tail handled outside the kernel, no pad round trips).
    k3, k4 = jax.random.split(k1)
    xr = jax.random.normal(k3, (3, 7, 13), dtype=jnp.float32)        # 273 elems
    yr = (jax.random.uniform(k4, (3, 7, 13)) > 0.5).astype(jnp.float32)
    loss3 = jax.block_until_ready(bce_with_logits_loss(xr, yr, pos_weight=2.0))
    ref3 = _reference_bce(xr, yr, pos_weight=2.0)
    ok &= bool(jnp.allclose(loss3, ref3, atol=1e-5, rtol=1e-5))

    assert ok, "mismatch vs reference"
    print("KERNEL_OK")
</pallas_src>

<mosaic_0001>
module attributes {stable_mosaic.version = 11 : i64} {
  func.func @kernel(%arg0: i32, %arg1: memref<8x128xf32, #tpu.memory_space<vmem>>, %arg2: memref<8x128xf32, #tpu.memory_space<vmem>>, %arg3: memref<8x128xf32, #tpu.memory_space<vmem>>) attributes {dimension_semantics = [#tpu.dimension_semantics<parallel>], iteration_bounds = array<i64: 2>, scalar_prefetch = 0 : i64, scratch_operands = 0 : i64, tpu.core_type = #tpu.core_type<tc>, window_params = [{transform_indices = @transform_0, window_bounds = array<i64: 8, 128>}, {transform_indices = @transform_1, window_bounds = array<i64: 8, 128>}, {transform_indices = @transform_2, window_bounds = array<i64: 8, 128>}]} {
    %c0 = arith.constant 0 : index
    %c0_0 = arith.constant 0 : index
    %0 = vector.load %arg1[%c0, %c0_0] : memref<8x128xf32, #tpu.memory_space<vmem>>, vector<8x128xf32>
    %c0_1 = arith.constant 0 : index
    %c0_2 = arith.constant 0 : index
    %1 = vector.load %arg2[%c0_1, %c0_2] : memref<8x128xf32, #tpu.memory_space<vmem>>, vector<8x128xf32>
    %2 = math.absf %0 : vector<8x128xf32>
    %cst = arith.constant 0.000000e+00 : f32
    %3 = vector.broadcast %cst : f32 to vector<8x128xf32>
    %4 = arith.subf %3, %2 : vector<8x128xf32>
    %5 = math.exp %4 : vector<8x128xf32>
    %6 = math.log1p %5 : vector<8x128xf32>
    %cst_3 = arith.constant 0.000000e+00 : f32
    %7 = vector.broadcast %cst_3 : f32 to vector<8x128xf32>
    %8 = arith.subf %7, %0 : vector<8x128xf32>
    %cst_4 = arith.constant 0.000000e+00 : f32
    %9 = vector.broadcast %cst_4 : f32 to vector<8x128xf32>
    %10 = arith.maximumf %8, %9 : vector<8x128xf32>
    %11 = arith.addf %6, %10 : vector<8x128xf32>
    %cst_5 = arith.constant 1.000000e+00 : f32
    %12 = vector.broadcast %cst_5 : f32 to vector<8x128xf32>
    %13 = arith.subf %12, %1 : vector<8x128xf32>
    %14 = arith.mulf %13, %0 : vector<8x128xf32>
    %15 = arith.addf %14, %11 : vector<8x128xf32>
    %c0_6 = arith.constant 0 : index
    %c0_7 = arith.constant 0 : index
    %16 = vector.load %arg3[%c0_6, %c0_7] : memref<8x128xf32, #tpu.memory_space<vmem>>, vector<8x128xf32>
    tpu.vector_store %arg3[%c0_6, %c0_7], %15 {strides = array<i32>} : memref<8x128xf32, #tpu.memory_space<vmem>>, vector<8x128xf32>,
    return
  }
  func.func @transform_0(%arg0: i32) -> (i32, i32) {
    %c0_i32 = arith.constant 0 : i32
    %c0_i32_0 = arith.constant 0 : i32
    return %arg0, %c0_i32 : i32, i32
  }
  func.func @transform_1(%arg0: i32) -> (i32, i32) {
    %c0_i32 = arith.constant 0 : i32
    %c0_i32_0 = arith.constant 0 : i32
    return %arg0, %c0_i32 : i32, i32
  }
  func.func @transform_2(%arg0: i32) -> (i32, i32) {
    %c0_i32 = arith.constant 0 : i32
    %c0_i32_0 = arith.constant 0 : i32
    return %arg0, %c0_i32 : i32, i32
  }
}

</mosaic_0001>

<bundles_post_ra>
// kernel: tpu_custom_call.1
= control target key start
LH: loop header
LB: loop body
LE: loop exit
PB: predicated region body
PF: predicated region fallthrough
CT: control target
= control target key end

     0   :  { %7 = vsyncpa [#allocation3], 0  ;;  %s759_s0 = inlined_call_operand.hbm [shape: f32[16,128], index: 0, kind: input, shape index: {}]   ;;  %s760_s1 = inlined_call_operand.hbm [shape: f32[16,128], index: 1, kind: input, shape index: {}]   ;;  %s761_s2 = inlined_call_operand.hbm [shape: f32[16,128], index: 2, kind: output, shape index: {}]  }
   0x1   :  { %9 = vsyncpa [#allocation3 + $0x1], 0 }
   0x2   :  { %10 = vsyncpa [#allocation6], 0 }
   0x3   :  { %12 = vsyncpa [#allocation6 + $0x1], 0 }
   0x4   :  { %13 = vsyncpa [#allocation4], 0 }
   0x5   :  { %15 = vsyncpa [#allocation4 + $0x1], 0  ;;  %s545_s9 = smov 0   ;;  %s547_s10 = smov 0  }
   0x6   :  { %s549_s11 = smov 0   ;;  %s551_s12 = smov 0  }
   0x7 LB: > { %s566_s13 = sadd.s32 4294967295, %s525_s12   ;;  %s325_s14 = sadd.s32 4294967294, %s525_s12   ;;  %s525_s12 = sphi %s551_s12, %s780_s12   ;;  %s521_s11 = sphi %s549_s11, %s779_s11   ;;  %s517_s10 = sphi %s547_s10, %s778_s10   ;;  %s513_s9 = sphi %s545_s9, %s777_s9  }
   0x8   : > { %s570_s15 = sadd.s32 1, %s525_s12   ;;  %s28_s16 = sadd.s32 1, %s521_s11 }
   0x9   : > { %s25_s17 = ssub.s32 %s525_s12, %s570_s15  ;;  %p35_p0 = scmp.ne.s32.totalorder %s521_s11, %s517_s10 }
   0xa   : > { %p26_p1 = scmp.eq.s32.totalorder %s25_s17, 0  ;;  %p36_p2 = scmp.eq.s32.totalorder %s525_s12, 0 }
   0xb   : > { %p41_p3 = scmp.ne.s32.totalorder %s517_s10, %s513_s9  ;;  %p42_p4 = scmp.eq.s32.totalorder %s566_s13, 0 }
   0xc   : > { %s582_s18 = scalar_select %p26_p1, %s521_s11, %s28_s16  }
   0xd   : > { %p584_p5 = por %p36_p2, %p35_p0  ;;  %p588_p6 = por %p42_p4, %p41_p3 }
   0xe   : > { %p91_p7 = scmp.eq.s32.totalorder %s566_s13, 1  ;;  %p97_p8 = scmp.eq.s32.totalorder %s325_s14, 1 }
   0xf   : > { %s765_s20 = scalar_select %p588_p6, 1, 0 }
  0x10   : > { %p357_p10 = scmp.lt.s32.totalorder %s525_s12, 2  ;;  %p595_p11 = por %p91_p7, %p35_p0 }
  0x11   : > { %p599_p12 = por %p97_p8, %p41_p3  ;;  %s604_s23 = sand.u32 1, %s521_s11  }
  0x12   : > { %s766_s21 = scalar_select %p595_p11, 1, 0 }
  0x13   : > { %s767_s22 = scalar_select %p599_p12, 1, 0 }
  0x14   : > { %s329_s24 = sshll.u32 %s525_s12, 7  ;;  %s328_s25 = sshll.u32 %s604_s23, 3 }
  0x15   : > { %s613_s28 = scalar_lea.hbm %s759_s0, %s329_s24  ;;  %s121_s29 = scalar_lea.vmem [#allocation2], %s328_s25 }
  0x16   : > { %s128_s30 = sshll.u32 %s121_s29, 4  ;;  %p619_p13 = pnand %p357_p10, %p584_p5  ;;  %s623_s30 = int_to_ptr.vmem [resolvable:$true] %s128_s30 }
  0x17   : > { %s118_s4 = scalar_lea.sflag [#allocation3], %s604_s23  ;;  %s395_s5 = scalar_lea.hbm %s613_s28, 128 }
  0x18   : > { %p396_p2 = scmp.ne.s32.totalorder %s613_s28, %s395_s5  ;;  %p397_p3 = pneg %p619_p13 }
  0x19   : > { %s400_s8 = scalar_lea.hbm %s759_s0, 256  ;;  %p401_p5 = scmp.lt.u32.totalorder %s613_s28, %s759_s0 }
  0x1a   : > { %p398_p4 = pnand %p397_p3, %p396_p2  ;;  %p402_p8 = scmp.lt.u32.totalorder %s400_s8, %s395_s5 }
  0x1b   : > { %p404_p9 = scmp.lt.u32.totalorder %s395_s5, %s613_s28 }
  0x1c   : > { %p399_p7 = pneg %p398_p4  ;;  %p403_p10 = por %p402_p8, %p401_p5 }
  0x1e   : > { %p405_p0 = por %p404_p9, %p403_p10 }
  0x20   : > { %p406_p1 = pnand %p405_p0, %p399_p7 }
  0x22   : > { %409 = shalt.err (!%p406_p1)
}
  0x23   : > { %s410_s17 = scalar_lea.vmem %s623_s30, 128  ;;  %s527_s19 = smov [#allocation2]  }
  0x24   : > { %p411_p2 = scmp.ne.s32.totalorder %s623_s30, %s410_s17  ;;  %s415_s26 = sshll.u32 %s527_s19, 4  ;;  %s416_s26 = int_to_ptr.vmem [resolvable:$false] %s415_s26 }
  0x25   : > { %s417_s27 = scalar_lea.vmem %s416_s26, 256  ;;  %p418_p11 = scmp.lt.s32.totalorder %s623_s30, %s416_s26 }
  0x26   : > { %p413_p4 = pnand %p411_p2, %p397_p3  ;;  %p419_p5 = scmp.lt.s32.totalorder %s417_s27, %s410_s17 }
  0x28   : > { %p414_p12 = pneg %p413_p4  ;;  %p420_p8 = por %p419_p5, %p418_p11 }
  0x2a   : > { %p421_p9 = pnand %p420_p8, %p414_p12 }
  0x2c   : > { %424 = shalt.err (!%p421_p9)
}
  0x2d   : > { %349 = dma.hbm_to_vmem [thread:$0]  (!%p619_p13), %s613_s28, 128, %s623_s30, %s118_s4  }
  0x2e   : > { %p769_p0 = scmp.lt.s32.totalorder %s525_s12, 3  ;;  %p770_p1 = scmp.ge.s32.totalorder %s525_s12, 1 }
  0x2f   : > { %s666_s7 = scalar_lea.hbm %s760_s1, %s329_s24  ;;  %s139_s8 = scalar_lea.vmem [#allocation5], %s328_s25 }
  0x30   : > { %p657_p7 = pnand %p770_p1, %p769_p0  ;;  %s146_s14 = sshll.u32 %s139_s8, 4  ;;  %s147_s14 = int_to_ptr.vmem [resolvable:$true] %s146_s14 }
  0x31   : > { %s136_s28 = scalar_lea.sflag [#allocation6], %s604_s23  ;;  %s425_s30 = scalar_lea.hbm %s666_s7, 128 }
  0x32   : > { %s771_s29 = scalar_select %p657_p7, 1, 0 }
  0x33   : > { %p426_p11 = scmp.ne.s32.totalorder %s666_s7, %s425_s30  ;;  %s430_s24 = scalar_lea.hbm %s760_s1, 256 }
  0x34   : > { %p431_p2 = scmp.lt.u32.totalorder %s666_s7, %s760_s1  ;;  %p432_p4 = scmp.lt.u32.totalorder %s430_s24, %s425_s30 }
  0x35   : > { %p428_p12 = pnand %p426_p11, %p397_p3  ;;  %p434_p8 = scmp.lt.u32.totalorder %s425_s30, %s666_s7 }
  0x36   : > { %p433_p5 = por %p432_p4, %p431_p2 }
  0x37   : > { %p429_p10 = pneg %p428_p12 }
  0x38   : > { %p435_p9 = por %p434_p8, %p433_p5 }
  0x3a   : > { %p436_p0 = pnand %p435_p9, %p429_p10 }
  0x3c   : > { %439 = shalt.err (!%p436_p0)
}
  0x3d   : > { %s440_s23 = scalar_lea.vmem %s147_s14, 128  ;;  %s528_s25 = smov [#allocation5]  }
  0x3e   : > { %p441_p1 = scmp.ne.s32.totalorder %s147_s14, %s440_s23  ;;  %s445_s26 = sshll.u32 %s528_s25, 4  ;;  %s446_s26 = int_to_ptr.vmem [resolvable:$false] %s445_s26 }
  0x3f   : > { %s447_s27 = scalar_lea.vmem %s446_s26, 256  ;;  %p448_p6 = scmp.lt.s32.totalorder %s147_s14, %s446_s26 }
  0x40   : > { %p443_p11 = pnand %p441_p1, %p397_p3  ;;  %p449_p7 = scmp.lt.s32.totalorder %s447_s27, %s440_s23 }
  0x42   : > { %p444_p12 = pneg %p443_p11  ;;  %p450_p2 = por %p449_p7, %p448_p6 }
  0x44   : > { %p451_p4 = pnand %p450_p2, %p444_p12 }
  0x46   : > { %454 = shalt.err (!%p451_p4)
}
  0x47   : > { %352 = dma.hbm_to_vmem [thread:$0]  (!%p619_p13), %s666_s7, 128, %s147_s14, %s136_s28  }
  0x48   : > { %p772_p10 = scmp.ne.s32.totalorder %s771_s29, 0 }
  0x49   : > { %s693_s5 = sand.u32 (!%p772_p10), 1, %s517_s10   ;;  %p773_p6 = scmp.ne.s32.totalorder (!%p772_p10), %s765_s20, 0 }
  0x4a   : > { %155 = sbr.rel (%p772_p10) target bundleno = 136 (0x88), region = 28  ;;  %s696_s6 = sshll.u32 (!%p772_p10), %s693_s5, 3 }
  0x4b   : > { %s158_s8 = scalar_lea.sflag (!%p772_p10), [#allocation3], %s693_s5  ;;  %s161_s30 = scalar_lea.vmem (!%p772_p10), [#allocation2], %s696_s6 }
  0x51   : > { %500 = dma.done.wait (%p773_p6), %s158_s8, 128  }
  0x52   : > { %502 = vsyncadd (%p773_p6), %s158_s8, 4294967168  ;;  %s167_s3 = scalar_lea.sflag [#allocation6], %s693_s5  ;;  %s170_s29 = scalar_lea.vmem [#allocation5], %s696_s6 }
  0x53   : > { %504 = dma.done.wait (%p773_p6), %s167_s3, 128  }
  0x54   : > { %506 = vsyncadd (%p773_p6), %s167_s3, 4294967168  ;;  %v196_v0 = vld [vmem:[%s161_s30] sm:$0xff]  ;;  %v197_v7 = vld [vmem:[%s170_s29] sm:$0xff]  ;;  %s195_s20 = scalar_lea.vmem [#allocation7], %s696_s6  ;;  %s337_s14 = sshll.u32 %s566_s13, 7 }
  0x55   : > { %v198_v1 = vand.u32 2147483647, %v196_v0  ;;  %v211_v10 = vsub.f32 0.0, %v196_v0  ;;  %v214_v11 = vsub.f32 1.0, %v197_v7  ;;  %s232_s7 = sshll.u32 %s195_s20, 4  ;;  %s717_s16 = scalar_lea.hbm %s761_s2, %s337_s14  ;;  %s712_s7 = int_to_ptr.vmem [resolvable:$true] %s232_s7 }
  0x56   : > { %s219_s24 = scalar_lea.sflag [#allocation4], %s693_s5  ;;  %s455_s17 = scalar_lea.vmem %s712_s7, 128 }
  0x57   : > { %v199_v2 = vsub.f32 0.0, %v198_v1  ;;  %v212_v14 = vmax.f32 %v211_v10, 0.0  ;;  %v215_v16 = vmul.f32 %v214_v11, %v196_v0  ;;  %p456_p13 = scmp.ne.s32.totalorder %s712_s7, %s455_s17  ;;  %p774_p3 = scmp.ne.s32.totalorder %s766_s21, 0 }
  0x58   : > { %s529_s13 = smov [#allocation7]  }
  0x59   : > { %v200_v3 = vmul.f32 1.442695, %v199_v2  ;;  %p457_p7 = pnand %p456_p13, %p774_p3  ;;  %s459_s19 = sshll.u32 %s529_s13, 4  ;;  %s460_s19 = int_to_ptr.vmem [resolvable:$false] %s459_s19 }
  0x5a   : > { %s461_s23 = scalar_lea.vmem %s460_s19, 256  ;;  %p462_p8 = scmp.lt.s32.totalorder %s712_s7, %s460_s19 }
  0x5b   : > { %391 = vpow2.f32 %v200_v3  ;;  %p458_p5 = pneg %p457_p7  ;;  %p463_p9 = scmp.lt.s32.totalorder %s461_s23, %s455_s17 }
  0x5d   : > { %p464_p0 = por %p463_p9, %p462_p8 }
  0x5f   : > { %p465_p1 = pnand %p464_p0, %p458_p5 }
  0x65   : > { %v392_v4 = vpop.eup %391 }
  0x66   : > { %v202_v5 = vadd.f32 1.0, %v392_v4  ;;  %v205_v6 = vmul.f32 -0.5, %v392_v4  ;;  %v208_v9 = vand.u32 2147483647, %v392_v4 }
  0x68   : > { %393 = vlog2.f32 %v202_v5  ;;  %v206_v8 = vadd.f32 1.0, %v205_v6  ;;  %vm209_vm0 = vcmp.lt.f32.partialorder %v208_v9, 0.0004427343 }
  0x6a   : > { %v207_v12 = vmul.f32 %v392_v4, %v206_v8 }
  0x72   : > { %v394_v13 = vpop.eup %393 }
  0x73   : > { %v204_v15 = vmul.f32 0.6931472, %v394_v13 }
  0x75   : > { %v210_v17 = vsel %vm209_vm0, %v207_v12, %v204_v15 }
  0x76   : > { %v213_v18 = vadd.f32 %v212_v14, %v210_v17 }
  0x78   : > { %v216_v19 = vadd.f32 %v215_v16, %v213_v18 }
  0x7a   : > { %217 = vst [vmem:[%s195_s20] sm:$0xff] %v216_v19 }
  0x7b   : > { %468 = shalt.err (!%p465_p1)
}
  0x7c   : > { %s469_s25 = scalar_lea.hbm %s717_s16, 128  ;;  %s473_s5 = scalar_lea.hbm %s761_s2, 256 }
  0x7d   : > { %p470_p11 = scmp.ne.s32.totalorder %s717_s16, %s469_s25  ;;  %p474_p4 = scmp.lt.u32.totalorder %s717_s16, %s761_s2 }
  0x7e   : > { %p475_p10 = scmp.lt.u32.totalorder %s473_s5, %s469_s25  ;;  %p477_p13 = scmp.lt.u32.totalorder %s469_s25, %s717_s16 }
  0x7f   : > { %p471_p12 = pnand %p470_p11, %p774_p3 }
  0x80   : > { %p476_p6 = por %p475_p10, %p474_p4 }
  0x81   : > { %p472_p2 = pneg %p471_p12 }
  0x82   : > { %p478_p7 = por %p477_p13, %p476_p6 }
  0x84   : > { %p479_p5 = pnand %p478_p7, %p472_p2 }
  0x86   : > { %482 = shalt.err (!%p479_p5)
}
  0x87   : > { %344 = dma.vmem_to_hbm [thread:$0]  (%p774_p3), %s712_s7, 128, %s717_s16, %s219_s24  }
  0x88 PF: > { %s244_s30 = sand.u32 1, %s513_s9   ;;  %p775_p8 = scmp.ne.s32.totalorder %s767_s22, 0 }
  0x89   : > { %p776_p9 = scmp.ge.s32.totalorder %s525_s12, 2  ;;  %s245_s3 = scalar_lea.sflag [#allocation4], %s244_s30 }
  0x8b   : > { %p354_p0 = pnand %p776_p9, %p775_p8 }
  0x8d   : > { %508 = dma.done.wait (!%p354_p0), %s245_s3, 128  }
  0x8e   : > { %510 = vsyncadd (!%p354_p0), %s245_s3, 4294967168  ;;  %p18_p1 = scmp.ge.s32.totalorder %s570_s15, 4   ;;  %s777_s9 = smov %s517_s10 }
  0x8f   : > { %s778_s10 = smov %s521_s11  ;;  %s779_s11 = smov %s582_s18 }
  0x90   : > { %s780_s12 = smov %s570_s15  ;;  %20 = sbr.rel (!%p18_p1) target bundleno = 7 (0x7), region = 86 }
  0x97   :  { %250 = vsyncpa [#allocation3], 1 }
  0x98   :  { %252 = vsyncpa [#allocation3 + $0x1], 1 }
  0x99   :  { %253 = vsyncpa [#allocation6], 1 }
  0x9a   :  { %255 = vsyncpa [#allocation6 + $0x1], 1 }
  0x9b   :  { %256 = vsyncpa [#allocation4], 1 }
  0x9c   :  { %258 = vsyncpa [#allocation4 + $0x1], 1 }

</bundles_post_ra>
